<compile_context>
chip_gen: v5e
topology: v5e:2x2
jax: 0.10.0
libtpu: 0.0.40
codegen_flags: <defaults>
</compile_context>

<pallas_src>
import jax
import jax.numpy as jnp
from jax.experimental import pallas as pl
from jax.experimental.pallas import tpu as pltpu


def _round_up(x: int, m: int) -> int:
    return ((x + m - 1) // m) * m


def _sigmoid_kernel(x_ref, o_ref):
    # Memory-bound elementwise op.  sigmoid(x) = 0.5*(tanh(x/2)+1): the only
    # transcendental-path op is one EUP tanh; no multi-op VALU divide.
    xf = x_ref[...].astype(jnp.float32)
    o_ref[...] = (0.5 * jnp.tanh(0.5 * xf) + 0.5).astype(o_ref.dtype)


def _pick_width(n: int):
    """Widest lane-dense last dim (multiple of 128) dividing n exactly;
    otherwise 1024 with a ragged tail of n % 1024 elements handled outside."""
    for w in (1024, 512, 256, 128):
        if n % w == 0:
            return w, 0
    return 1024, n % 1024


def _pick_block_rows(rows: int, width: int, itemsize: int, target_block_bytes: int) -> int:
    # ~target_block_bytes per block; row count a multiple of 32 sublanes so the
    # same tiling stays legal for f32 / bf16 / int8 sublane packing.
    block_rows = max(32, (target_block_bytes // (itemsize * width)) // 32 * 32)
    # Cap so there are >= 2 grid steps whenever the array is large enough: the
    # "parallel" axis can then shard over both v7x TensorCores, roughly
    # doubling aggregate HBM streaming bandwidth for mid-size tensors.
    block_rows = min(block_rows, max(32, _round_up(pl.cdiv(rows, 2), 32)))
    if block_rows > rows:
        block_rows = rows  # full-extent block dim is always legal
    return block_rows


def sigmoid_pallas(
    x: jax.Array,
    *,
    target_block_bytes: int = 4 * 1024 * 1024,
    min_pallas_bytes: int = 1024 * 1024,
) -> jax.Array:
    """Elementwise sigmoid matching torch.sigmoid semantics (shape/dtype preserved)."""
    orig_shape = x.shape
    orig_dtype = x.dtype
    n = x.size
    itemsize = jnp.dtype(orig_dtype).itemsize

    # Small-tensor fast path: kernel launch + pipeline setup dwarfs the work.
    if n == 0 or n * itemsize < min_pallas_bytes:
        return jax.nn.sigmoid(x)

    width, tail = _pick_width(n)
    n_main = n - tail
    rows = n_main // width
    if rows == 0:
        # Entire tensor is smaller than one lane-dense row.
        return jax.nn.sigmoid(x)

    block_rows = _pick_block_rows(rows, width, itemsize, target_block_bytes)
    grid = (pl.cdiv(rows, block_rows),)

    x_flat = jnp.reshape(x, (-1,))
    # When tail == 0 this slice is the whole array (XLA elides it); otherwise
    # only the lane-aligned bulk goes through the kernel -- no pad/slice of the
    # full tensor, no extra HBM passes over the bulk.
    x2d = jnp.reshape(x_flat[:n_main], (rows, width))

    out2d = pl.pallas_call(
        _sigmoid_kernel,
        out_shape=jax.ShapeDtypeStruct((rows, width), orig_dtype),
        grid_spec=pltpu.PrefetchScalarGridSpec(
            num_scalar_prefetch=0,
            grid=grid,
            in_specs=[pl.BlockSpec((block_rows, width), lambda i: (i, 0))],
            out_specs=pl.BlockSpec((block_rows, width), lambda i: (i, 0)),
        ),
        compiler_params=pltpu.CompilerParams(
            dimension_semantics=("parallel",),
            # 4 MiB blocks double-buffered in+out => ~16 MiB working set.
            # 48 MiB limit lifts v5e's 16 MiB scoped default and leaves
            # headroom under v7x's 64 MiB physical VMEM.
            vmem_limit_bytes=48 * 1024 * 1024,
        ),
        cost_estimate=pl.CostEstimate(
            flops=3 * n_main,
            transcendentals=n_main,
            bytes_accessed=2 * n_main * itemsize,
        ),
    )(x2d)

    out_flat = jnp.reshape(out2d, (-1,))
    if tail:
        # <1024-element remainder: cheapest to fold in with plain XLA sigmoid.
        out_tail = jax.nn.sigmoid(x_flat[n_main:])
        out_flat = jnp.concatenate([out_flat, out_tail])
    return jnp.reshape(out_flat, orig_shape)


if __name__ == "__main__":
    key = jax.random.PRNGKey(0)
    k0, k1, k2 = jax.random.split(key, 3)

    # Small NCHW input consistent with the module's (elementwise) forward pass.
    x = jax.random.normal(k0, (2, 4, 16, 16), dtype=jnp.float32)
    ref = jax.nn.sigmoid(x)

    # Force the Pallas path for this small demo input so the kernel actually
    # compiles and runs on the TPU.
    y = sigmoid_pallas(x, min_pallas_bytes=0)
    jax.block_until_ready(y)
    assert y.shape == x.shape and y.dtype == x.dtype
    assert jnp.max(jnp.abs(y - ref)) < 1e-5

    # Default wrapper (small-tensor fast path) must agree too.
    y_fast = sigmoid_pallas(x)
    jax.block_until_ready(y_fast)
    assert jnp.max(jnp.abs(y_fast - ref)) < 1e-5

    # Ragged element count (not a multiple of 128): lane-aligned bulk through
    # the kernel, <1024-element tail via jax.nn.sigmoid (no pad/slice passes).
    xr = jax.random.normal(k1, (3, 7, 11, 5), dtype=jnp.float32)  # 1155 elems
    yr = sigmoid_pallas(xr, min_pallas_bytes=0)
    jax.block_until_ready(yr)
    assert yr.shape == xr.shape and yr.dtype == xr.dtype
    assert jnp.max(jnp.abs(yr - jax.nn.sigmoid(xr))) < 1e-5

    # Mid-size input: exercises the >=2-step "parallel" grid (dual-TC on v7x).
    xm = jax.random.normal(k2, (4, 16, 64, 64), dtype=jnp.float32)  # 1 MiB
    ym = sigmoid_pallas(xm, min_pallas_bytes=0)
    jax.block_until_ready(ym)
    assert jnp.max(jnp.abs(ym - jax.nn.sigmoid(xm))) < 1e-5

    print("KERNEL_OK")
</pallas_src>

<mosaic_0001>
module attributes {stable_mosaic.version = 11 : i64} {
  func.func @_sigmoid_kernel(%arg0: i32, %arg1: memref<2x1024xf32, #tpu.memory_space<vmem>>, %arg2: memref<2x1024xf32, #tpu.memory_space<vmem>>) attributes {dimension_semantics = [#tpu.dimension_semantics<parallel>], iteration_bounds = array<i64: 1>, scalar_prefetch = 0 : i64, scratch_operands = 0 : i64, tpu.core_type = #tpu.core_type<tc>, window_params = [{transform_indices = @transform_0, window_bounds = array<i64: 2, 1024>}, {transform_indices = @transform_1, window_bounds = array<i64: 2, 1024>}]} {
    %c0 = arith.constant 0 : index
    %c0_0 = arith.constant 0 : index
    %0 = vector.load %arg1[%c0, %c0_0] : memref<2x1024xf32, #tpu.memory_space<vmem>>, vector<2x1024xf32>
    %cst = arith.constant 5.000000e-01 : f32
    %1 = vector.broadcast %cst : f32 to vector<2x1024xf32>
    %2 = arith.mulf %1, %0 : vector<2x1024xf32>
    %3 = math.tanh %2 : vector<2x1024xf32>
    %cst_1 = arith.constant 5.000000e-01 : f32
    %4 = vector.broadcast %cst_1 : f32 to vector<2x1024xf32>
    %5 = arith.mulf %4, %3 : vector<2x1024xf32>
    %cst_2 = arith.constant 5.000000e-01 : f32
    %6 = vector.broadcast %cst_2 : f32 to vector<2x1024xf32>
    %7 = arith.addf %5, %6 : vector<2x1024xf32>
    %c0_3 = arith.constant 0 : index
    %c0_4 = arith.constant 0 : index
    %8 = vector.load %arg2[%c0_3, %c0_4] : memref<2x1024xf32, #tpu.memory_space<vmem>>, vector<2x1024xf32>
    tpu.vector_store %arg2[%c0_3, %c0_4], %7 {strides = array<i32>} : memref<2x1024xf32, #tpu.memory_space<vmem>>, vector<2x1024xf32>,
    return
  }
  func.func @transform_0(%arg0: i32) -> (i32, i32) {
    %c0_i32 = arith.constant 0 : i32
    %c0_i32_0 = arith.constant 0 : i32
    return %arg0, %c0_i32 : i32, i32
  }
  func.func @transform_1(%arg0: i32) -> (i32, i32) {
    %c0_i32 = arith.constant 0 : i32
    %c0_i32_0 = arith.constant 0 : i32
    return %arg0, %c0_i32 : i32, i32
  }
}

</mosaic_0001>

<bundles_post_ra>
// kernel: tpu_custom_call.1
= control target key start
LH: loop header
LB: loop body
LE: loop exit
PB: predicated region body
PF: predicated region fallthrough
CT: control target
= control target key end

     0   :  { %6 = vsyncpa [#allocation3], 0  ;;  %s128_s0 = inlined_call_operand.hbm [shape: f32[2,1024], index: 0, kind: input, shape index: {}]   ;;  %s129_s1 = inlined_call_operand.hbm [shape: f32[2,1024], index: 1, kind: output, shape index: {}]  }
   0x1   :  { %7 = vsyncpa [#allocation4], 0  ;;  %s13_s8 = sshll.u32 %s128_s0, 4  ;;  %s110_s9 = smov [#allocation2]   ;;  %s14_s8 = int_to_ptr.hbm [resolvable:$true] %s13_s8 }
   0x2   :  { %s15_s10 = sshll.u32 %s110_s9, 4  ;;  %s16_s10 = int_to_ptr.vmem [resolvable:$true] %s15_s10 }
   0x3   :  { %18 = dma.hbm_to_vmem [thread:$0]  %s14_s8, 256, %s16_s10, [#allocation3]  }
   0x4   :  { %106 = dma.done.wait [#allocation3], 256  }
   0x5   :  { %107 = vsyncadd [#allocation3], 4294967040  ;;  %v23_v0 = vld [vmem:[#allocation2] sm:$0xff]  ;;  %v24_v1 = vld [vmem:[#allocation2 + $0x8] sm:$0xff]  ;;  %s111_s11 = smov [#allocation5]   ;;  %s42_s14 = sshll.u32 %s129_s1, 4  ;;  %s43_s14 = int_to_ptr.hbm [resolvable:$true] %s42_s14 }
   0x6   :  { %v25_v2 = vmul.f32 0.5, %v23_v0  ;;  %v26_v3 = vmul.f32 0.5, %v24_v1  ;;  %s40_s12 = sshll.u32 %s111_s11, 4  ;;  %s41_s12 = int_to_ptr.vmem [resolvable:$true] %s40_s12 }
   0x8   :  { %54 = vtanh.f32 %v25_v2 }
   0x9   :  { %56 = vtanh.f32 %v26_v3 }
   0xe   :  { %v55_v4 = vpop.eup %54 }
   0xf   :  { %v57_v5 = vpop.eup %56  ;;  %v29_v6 = vmul.f32 0.5, %v55_v4 }
  0x10   :  { %v30_v7 = vmul.f32 0.5, %v57_v5 }
  0x11   :  { %v31_v8 = vadd.f32 0.5, %v29_v6 }
  0x12   :  { %v32_v9 = vadd.f32 0.5, %v30_v7 }
  0x13   :  { %33 = vst [vmem:[#allocation5] sm:$0xff] %v31_v8 }
  0x14   :  { %34 = vst [vmem:[#allocation5 + $0x8] sm:$0xff] %v32_v9 }
  0x15   :  { %45 = dma.vmem_to_hbm [thread:$0]  %s41_s12, 256, %s43_s14, [#allocation4]  }
  0x16   :  { %108 = dma.done.wait [#allocation4], 256  }
  0x17   :  { %109 = vsyncadd [#allocation4], 4294967040 }
  0x18   :  { %50 = vsyncpa [#allocation3], 1 }
  0x19   :  { %51 = vsyncpa [#allocation4], 1 }

</bundles_post_ra>
